<compile_context>
chip_gen: v7x
topology: tpu7x:2x2x1
jax: 0.10.0
libtpu: 0.0.40
codegen_flags: <defaults>
</compile_context>

<pallas_src>
import functools

import jax
import jax.numpy as jnp
from jax.experimental import pallas as pl
from jax.experimental.pallas import tpu as pltpu

TOKEN_SELF_ATTN_VALUE = -50000.0


def _fullqk_kernel(q_ref, kt_ref, v_ref, out_ref, dot_ref, *,
                   query_len, causal, compute_dtype):
    # q_ref:   (1, tq, D)  raw (un-normalized) query rows, pre-scaled dtype
    # kt_ref:  (1, D,  S)  L2-normalized keys, transposed (contraction-major)
    # v_ref:   (1, S,  D)  values
    # out_ref: (1, tq, D)  attention output
    # dot_ref: (1, tq, S)  softmax attention weights
    tq = q_ref.shape[1]
    D = q_ref.shape[2]
    S = kt_ref.shape[2]

    # Fold dim**-0.5 into q (tq*D multiplies instead of tq*S after the matmul).
    scale = jnp.asarray(D ** -0.5, dtype=compute_dtype)
    q = q_ref[0] * scale                                       # [tq, D]

    # scores = (q * scale) @ k^T, f32 accumulation on the MXU.
    s = jax.lax.dot_general(
        q, kt_ref[0],
        (((1,), (0,)), ((), ())),
        preferred_element_type=jnp.float32,
    )                                                          # [tq, S] f32

    # Diagonal (+ optional causal) masking with broadcast iotas:
    # row is (tq,1), col is (1,S) -> no full (tq,S) int32 tensors live.
    qi = pl.program_id(1)
    row = qi * tq + jax.lax.broadcasted_iota(jnp.int32, (tq, 1), 0)
    col = jax.lax.broadcasted_iota(jnp.int32, (1, S), 1)

    s = jnp.where(row == col, TOKEN_SELF_ATTN_VALUE, s)
    if causal:
        masked_value = -jnp.finfo(jnp.float32).max
        # torch: triu_indices(t, t, 1) -> strict upper triangle, cols < query_len
        s = jnp.where((col > row) & (col < query_len), masked_value, s)

    # Stable softmax over the key axis.  The diagonal guarantees the row max is
    # >= -50000 so exp never overflows; masked entries underflow to 0.
    m = jnp.max(s, axis=-1, keepdims=True)
    p = jnp.exp(s - m)
    l = jnp.sum(p, axis=-1, keepdims=True)
    inv = pl.reciprocal(l, approx=False)     # (tq,1) reciprocal, exact
    p = p * inv                              # normalized weights, f32

    # Single cast of the largest live tensor; reuse for store AND matmul.
    p_mm = p.astype(compute_dtype)
    if jnp.dtype(dot_ref.dtype) == jnp.dtype(compute_dtype):
        dot_ref[0] = p_mm
    else:
        dot_ref[0] = p.astype(dot_ref.dtype)

    out = jnp.dot(p_mm, v_ref[0], preferred_element_type=jnp.float32)  # [tq, D]
    out_ref[0] = out.astype(out_ref.dtype)


def _round_up(x, m):
    return ((x + m - 1) // m) * m


def _vmem_limit_bytes():
    # Adapt to the chip generation (v5e/v6e: 128 MiB, v7x: 64 MiB physical).
    try:
        cap = pltpu.get_tpu_info().vmem_capacity_bytes
    except Exception:
        cap = 64 * 1024 * 1024
    return int(min(cap * 0.8, 100 * 1024 * 1024))


def _pick_row_tile(T, S, D, itemsize, budget_bytes):
    """Largest row tile whose per-step live set fits the VMEM budget."""
    # Rough live-set per grid step:
    #   f32 scores + probs:          2 * tq * S * 4
    #   dot output block (2 bufs):   2 * tq * S * itemsize
    #   K^T + V blocks (2 bufs ea):  4 * S * D * itemsize
    #   q + out blocks (2 bufs ea):  4 * tq * D * itemsize
    for tq in (512, 256, 128, 64, 32, 16, 8):
        live = (2 * tq * S * 4 + 2 * tq * S * itemsize
                + 4 * S * D * itemsize + 4 * tq * D * itemsize)
        if live <= budget_bytes:
            return tq
    return 8


def full_qk_attention(qk, v, *, query_len=None, causal=False,
                      row_tile=None, compute_in_bf16=False):
    """qk, v: [B, S, D] -> (out [B, T, D], dot [B, T, S], empty(0))."""
    B, S, D = qk.shape
    assert v.shape == (B, S, D)
    T = S if query_len is None else query_len

    # bf16 inputs ride the MXU bf16 fast path; f32 inputs keep f32 numerics
    # unless the caller opts into the bf16 compute path.
    use_bf16 = (qk.dtype == jnp.bfloat16) or compute_in_bf16
    compute_dtype = jnp.bfloat16 if use_bf16 else jnp.float32
    in_item = jnp.dtype(compute_dtype).itemsize
    out_item = jnp.dtype(qk.dtype).itemsize

    vmem_limit = _vmem_limit_bytes()
    if row_tile is None:
        row_tile = _pick_row_tile(T, S, D, in_item, budget_bytes=vmem_limit // 2)

    # Row tile is always a multiple of 8 (keeps every block layout-legal);
    # ragged query counts are handled by padding, not an assert.
    tq = min(row_tile, _round_up(max(T, 1), 8))
    n_q = pl.cdiv(T, tq)
    T_pad = n_q * tq

    # Queries: raw (un-normalized), cast once to the compute dtype, padded.
    q = qk[:, :T].astype(compute_dtype)
    if T_pad != T:
        q = jnp.pad(q, ((0, 0), (0, T_pad - T), (0, 0)))

    # Keys: normalize ONCE per call (hoisted out of the per-tile kernel) and
    # pre-transpose to (B, D, S) so the kernel matmul needs no XLU transpose.
    kf = qk.astype(jnp.float32)
    nrm = jnp.sqrt(jnp.sum(kf * kf, axis=-1, keepdims=True))
    kn = (kf / jnp.maximum(nrm, 1e-12)).astype(compute_dtype)   # F.normalize, eps=1e-12
    kt = jnp.swapaxes(kn, 1, 2)                                 # (B, D, S)

    vc = v.astype(compute_dtype)

    kernel = functools.partial(_fullqk_kernel, query_len=T, causal=causal,
                               compute_dtype=compute_dtype)

    cost = pl.CostEstimate(
        flops=int(4 * B * T_pad * S * D),            # two matmuls
        transcendentals=int(B * T_pad * S),          # exp
        bytes_accessed=int(B * T_pad * D * in_item   # q read
                           + 2 * B * S * D * in_item # kt + v read (once/batch)
                           + B * T_pad * D * out_item  # out write
                           + B * T_pad * S * out_item  # dot write (dominant)
                           ),
    )

    out, dot = pl.pallas_call(
        kernel,
        out_shape=(
            jax.ShapeDtypeStruct((B, T_pad, D), qk.dtype),
            jax.ShapeDtypeStruct((B, T_pad, S), qk.dtype),
        ),
        grid_spec=pltpu.PrefetchScalarGridSpec(
            num_scalar_prefetch=0,
            grid=(B, n_q),
            in_specs=[
                pl.BlockSpec((1, tq, D), lambda b, i: (b, i, 0)),  # raw queries
                pl.BlockSpec((1, D, S), lambda b, i: (b, 0, 0)),   # normalized K^T
                pl.BlockSpec((1, S, D), lambda b, i: (b, 0, 0)),   # values
            ],
            out_specs=(
                pl.BlockSpec((1, tq, D), lambda b, i: (b, i, 0)),  # out
                pl.BlockSpec((1, tq, S), lambda b, i: (b, i, 0)),  # attn weights
            ),
        ),
        compiler_params=pltpu.CompilerParams(
            dimension_semantics=("parallel", "parallel"),
            vmem_limit_bytes=vmem_limit,
        ),
        cost_estimate=cost,
    )(q, kt, vc)

    if T_pad != T:
        out = out[:, :T]
        dot = dot[:, :T]
    return out, dot, jnp.empty((0,), dtype=qk.dtype)


def full_qk_attention_reference(qk, v, *, query_len=None, causal=False):
    B, S, D = qk.shape
    T = S if query_len is None else query_len
    qf = qk[:, :T].astype(jnp.float32)
    kf = qk.astype(jnp.float32)
    kf = kf / jnp.maximum(jnp.linalg.norm(kf, axis=-1, keepdims=True), 1e-12)
    dot = jnp.einsum('bie,bje->bij', qf, kf) * (D ** -0.5)
    i = jnp.arange(T)
    dot = dot.at[:, i, i].set(TOKEN_SELF_ATTN_VALUE)
    if causal:
        row = i[:, None]
        col = jnp.arange(S)[None, :]
        dot = jnp.where((col > row) & (col < T), -jnp.finfo(jnp.float32).max, dot)
    dot = jax.nn.softmax(dot, axis=-1)
    out = jnp.einsum('bij,bje->bie', dot, v.astype(jnp.float32))
    return out.astype(qk.dtype), dot.astype(qk.dtype)


if __name__ == "__main__":
    key = jax.random.PRNGKey(0)
    B, S, D = 2, 8, 32

    kq, kv = jax.random.split(key)
    qk = jax.random.normal(kq, (B, S, D), dtype=jnp.float32)
    v = jax.random.normal(kv, (B, S, D), dtype=jnp.float32)

    for causal in (False, True):
        for qlen in (None, 6):
            T = S if qlen is None else qlen
            out, dot, extra = full_qk_attention(qk, v, query_len=qlen, causal=causal)
            out = jax.block_until_ready(out)
            dot = jax.block_until_ready(dot)

            ref_out, ref_dot = full_qk_attention_reference(qk, v, query_len=qlen,
                                                           causal=causal)
            assert out.shape == (B, T, D) and dot.shape == (B, T, S)
            assert extra.shape == (0,)
            assert jnp.allclose(out, ref_out, atol=1e-4, rtol=1e-4), \
                f"out max err (causal={causal}, T={T}): {jnp.max(jnp.abs(out - ref_out))}"
            assert jnp.allclose(dot, ref_dot, atol=1e-4, rtol=1e-4), \
                f"dot max err (causal={causal}, T={T}): {jnp.max(jnp.abs(dot - ref_dot))}"

    print("KERNEL_OK")
</pallas_src>

<mosaic_0001>
module attributes {stable_mosaic.version = 11 : i64} {
  func.func @_fullqk_kernel(%arg0: i32, %arg1: i32, %arg2: memref<1x8x32xf32, #tpu.memory_space<vmem>>, %arg3: memref<1x32x8xf32, #tpu.memory_space<vmem>>, %arg4: memref<1x8x32xf32, #tpu.memory_space<vmem>>, %arg5: memref<1x8x32xf32, #tpu.memory_space<vmem>>, %arg6: memref<1x8x8xf32, #tpu.memory_space<vmem>>) attributes {dimension_semantics = [#tpu.dimension_semantics<parallel>, #tpu.dimension_semantics<parallel>], iteration_bounds = array<i64: 2, 1>, scalar_prefetch = 0 : i64, scratch_operands = 0 : i64, tpu.core_type = #tpu.core_type<tc>, window_params = [{transform_indices = @transform_0, window_bounds = array<i64: 1, 8, 32>}, {transform_indices = @transform_1, window_bounds = array<i64: 1, 32, 8>}, {transform_indices = @transform_2, window_bounds = array<i64: 1, 8, 32>}, {transform_indices = @transform_3, window_bounds = array<i64: 1, 8, 32>}, {transform_indices = @transform_4, window_bounds = array<i64: 1, 8, 8>}]} {
    %c0 = arith.constant 0 : index
    %c0_0 = arith.constant 0 : index
    %c0_1 = arith.constant 0 : index
    %0 = vector.load %arg2[%c0, %c0_0, %c0_1] : memref<1x8x32xf32, #tpu.memory_space<vmem>>, vector<1x8x32xf32>
    %1 = vector.shape_cast %0 : vector<1x8x32xf32> to vector<8x32xf32>
    %cst = arith.constant 0.176776692 : f32
    %2 = vector.broadcast %cst : f32 to vector<8x32xf32>
    %3 = arith.mulf %1, %2 : vector<8x32xf32>
    %c0_2 = arith.constant 0 : index
    %c0_3 = arith.constant 0 : index
    %c0_4 = arith.constant 0 : index
    %4 = vector.load %arg3[%c0_2, %c0_3, %c0_4] : memref<1x32x8xf32, #tpu.memory_space<vmem>>, vector<1x32x8xf32>
    %5 = vector.shape_cast %4 : vector<1x32x8xf32> to vector<32x8xf32>
    %cst_5 = arith.constant dense<0.000000e+00> : vector<8x8xf32>
    %6 = tpu.matmul %3, %5, %cst_5 {dimension_numbers = #tpu.dot_dimension_numbers<[1], [0], [0], [1], [0, 0, 1, 1], [], []>} : vector<8x32xf32>, vector<32x8xf32>, vector<8x8xf32> -> vector<8x8xf32>
    %c8_i32 = arith.constant 8 : i32
    %7 = arith.muli %arg1, %c8_i32 : i32
    %8 = tpu.iota {dimensions = array<i32: 0>} : vector<8x1xi32>
    %9 = vector.broadcast %7 : i32 to vector<8x1xi32>
    %10 = arith.addi %9, %8 : vector<8x1xi32>
    %11 = tpu.iota {dimensions = array<i32: 1>} : vector<1x8xi32>
    %12 = vector.broadcast %10 : vector<8x1xi32> to vector<8x8xi32>
    %13 = vector.broadcast %11 : vector<1x8xi32> to vector<8x8xi32>
    %14 = arith.cmpi eq, %12, %13 : vector<8x8xi32>
    %cst_6 = arith.constant -5.000000e+04 : f32
    %15 = vector.broadcast %cst_6 : f32 to vector<8x8xf32>
    %16 = arith.select %14, %15, %6 : vector<8x8xi1>, vector<8x8xf32>
    %cst_7 = arith.constant dense<0xFF800000> : vector<8xf32>
    %17 = vector.multi_reduction <maximumf>, %16, %cst_7 [1] : vector<8x8xf32> to vector<8xf32>
    %18 = vector.shape_cast %17 : vector<8xf32> to vector<8x1xf32>
    %19 = vector.broadcast %18 : vector<8x1xf32> to vector<8x8xf32>
    %20 = arith.subf %16, %19 : vector<8x8xf32>
    %21 = math.exp %20 : vector<8x8xf32>
    %cst_8 = arith.constant dense<0.000000e+00> : vector<8xf32>
    %22 = vector.multi_reduction <add>, %21, %cst_8 [1] : vector<8x8xf32> to vector<8xf32>
    %23 = vector.shape_cast %22 : vector<8xf32> to vector<8x1xf32>
    %24 = tpu.reciprocal %23 : vector<8x1xf32> -> vector<8x1xf32>
    %25 = vector.broadcast %24 : vector<8x1xf32> to vector<8x8xf32>
    %26 = arith.mulf %21, %25 : vector<8x8xf32>
    %c0_9 = arith.constant 0 : index
    %c0_10 = arith.constant 0 : index
    %c0_11 = arith.constant 0 : index
    %27 = vector.load %arg6[%c0_9, %c0_10, %c0_11] : memref<1x8x8xf32, #tpu.memory_space<vmem>>, vector<1x8x8xf32>
    %28 = vector.shape_cast %27 : vector<1x8x8xf32> to vector<8x8xf32>
    %29 = vector.shape_cast %26 : vector<8x8xf32> to vector<1x8x8xf32>
    tpu.vector_store %arg6[%c0_9, %c0_10, %c0_11], %29 {strides = array<i32>} : memref<1x8x8xf32, #tpu.memory_space<vmem>>, vector<1x8x8xf32>,
    %c0_12 = arith.constant 0 : index
    %c0_13 = arith.constant 0 : index
    %c0_14 = arith.constant 0 : index
    %30 = vector.load %arg4[%c0_12, %c0_13, %c0_14] : memref<1x8x32xf32, #tpu.memory_space<vmem>>, vector<1x8x32xf32>
    %31 = vector.shape_cast %30 : vector<1x8x32xf32> to vector<8x32xf32>
    %cst_15 = arith.constant dense<0.000000e+00> : vector<8x32xf32>
    %32 = tpu.matmul %26, %31, %cst_15 {dimension_numbers = #tpu.dot_dimension_numbers<[1], [0], [0], [1], [0, 0, 1, 1], [], []>} : vector<8x8xf32>, vector<8x32xf32>, vector<8x32xf32> -> vector<8x32xf32>
    %c0_16 = arith.constant 0 : index
    %c0_17 = arith.constant 0 : index
    %c0_18 = arith.constant 0 : index
    %33 = vector.load %arg5[%c0_16, %c0_17, %c0_18] : memref<1x8x32xf32, #tpu.memory_space<vmem>>, vector<1x8x32xf32>
    %34 = vector.shape_cast %33 : vector<1x8x32xf32> to vector<8x32xf32>
    %35 = vector.shape_cast %32 : vector<8x32xf32> to vector<1x8x32xf32>
    tpu.vector_store %arg5[%c0_16, %c0_17, %c0_18], %35 {strides = array<i32>} : memref<1x8x32xf32, #tpu.memory_space<vmem>>, vector<1x8x32xf32>,
    return
  }
  func.func @transform_0(%arg0: i32, %arg1: i32) -> (i32, i32, i32) {
    %c0_i32 = arith.constant 0 : i32
    %c0_i32_0 = arith.constant 0 : i32
    return %arg0, %arg1, %c0_i32 : i32, i32, i32
  }
  func.func @transform_1(%arg0: i32, %arg1: i32) -> (i32, i32, i32) {
    %c0_i32 = arith.constant 0 : i32
    %c0_i32_0 = arith.constant 0 : i32
    %c0_i32_1 = arith.constant 0 : i32
    return %arg0, %c0_i32, %c0_i32_0 : i32, i32, i32
  }
  func.func @transform_2(%arg0: i32, %arg1: i32) -> (i32, i32, i32) {
    %c0_i32 = arith.constant 0 : i32
    %c0_i32_0 = arith.constant 0 : i32
    %c0_i32_1 = arith.constant 0 : i32
    return %arg0, %c0_i32, %c0_i32_0 : i32, i32, i32
  }
  func.func @transform_3(%arg0: i32, %arg1: i32) -> (i32, i32, i32) {
    %c0_i32 = arith.constant 0 : i32
    %c0_i32_0 = arith.constant 0 : i32
    return %arg0, %arg1, %c0_i32 : i32, i32, i32
  }
  func.func @transform_4(%arg0: i32, %arg1: i32) -> (i32, i32, i32) {
    %c0_i32 = arith.constant 0 : i32
    %c0_i32_0 = arith.constant 0 : i32
    return %arg0, %arg1, %c0_i32 : i32, i32, i32
  }
}

</mosaic_0001>

<bundles_post_ra>
// kernel: tpu_custom_call.1
= control target key start
LH: loop header
LB: loop body
LE: loop exit
PB: predicated region body
PF: predicated region fallthrough
CT: control target
= control target key end

     0   :  { %10 = vsyncpa [#allocation3], 0  ;;  %s1032_s0 = inlined_call_operand.vmem [shape: f32[2,8,32], index: 0, kind: input, shape index: {}]   ;;  %s1033_s1 = inlined_call_operand.vmem [shape: f32[2,32,8], index: 1, kind: input, shape index: {}]   ;;  %s1034_s2 = inlined_call_operand.vmem [shape: f32[2,8,32], index: 2, kind: input, shape index: {}]   ;;  %s1035_s3 = inlined_call_operand.hbm [shape: f32[2,8,32], index: 3, kind: output, shape index: {0}]   ;;  %s1036_s4 = inlined_call_operand.hbm [shape: f32[2,8,8], index: 4, kind: output, shape index: {1}]  }
   0x1   :  { %12 = vsyncpa [#allocation3 + $0x1], 0 }
   0x2   :  { %13 = vsyncpa [#allocation5], 0 }
   0x3   :  { %15 = vsyncpa [#allocation5 + $0x1], 0  ;;  %s865_s15 = smov 0   ;;  %s867_s16 = smov 0  }
   0x4   :  { %s869_s17 = smov 0   ;;  %s871_s18 = smov 0  }
   0x5   :  { %s873_s19 = smov 0   ;;  %s875_s20 = smov 0  }
   0x6 LB: > { %s607_s21 = sadd.s32 4294967295, %s833_s20   ;;  %s608_s22 = sadd.s32 4294967294, %s833_s20   ;;  %s833_s20 = sphi %s875_s20, %s21_s20   ;;  %s829_s19 = sphi %s873_s19, %s1043_s19   ;;  %s825_s18 = sphi %s871_s18, %s1042_s18   ;;  %s821_s17 = sphi %s869_s17, %s1041_s17   ;;  %s817_s16 = sphi %s867_s16, %s1040_s16   ;;  %s813_s15 = sphi %s865_s15, %s1039_s15  }
   0x7   : > { %s33_s23 = sadd.s32 1, %s829_s19  ;;  %s122_s24 = sadd.s32 1, %s821_s17 }
   0x8   : > { %p35_p0 = scmp.ge.s32.totalorder %s33_s23, 2  ;;  %p132_p1 = scmp.ne.s32.totalorder %s821_s17, %s817_s16 }
   0x9   : > { %p133_p2 = scmp.eq.s32.totalorder %s607_s21, 1  ;;  %p138_p3 = scmp.ne.s32.totalorder %s817_s16, %s813_s15 }
   0xa   : > { %s1045_s23 = smov (%p35_p0, %s33_s23), 0  ;;  %p139_p5 = scmp.eq.s32.totalorder %s608_s22, 1 }
   0xb   : > { %p905_p4 = por %p133_p2, %p132_p1  ;;  %s117_s26 = ssub.s32 %s829_s19, %s1045_s23 }
   0xc   : > { %p611_p6 = scmp.ge.s32.totalorder %s833_s20, 1  ;;  %p120_p7 = scmp.eq.s32.totalorder %s117_s26, 0 }
   0xd   : > { %p912_p8 = por %p139_p5, %p138_p3  ;;  %p210_p9 = scmp.lt.s32.totalorder %s833_s20, 3 }
   0xe   : > { %s918_s28 = scalar_select %p120_p7, %s821_s17, %s122_s24  }
   0xf   : > { %p211_p10 = pnand %p611_p6, %p210_p9 }
  0x10   : > { %p252_p11 = scmp.lt.s32.totalorder (!%p211_p10), %s825_s18, 1  ;;  %v835_v0 = vmov (!%p211_p10), 0.0|0.0   ;;  %vm836_vm0 = vmmov (!%p211_p10), 0   ;;  %v837_v1 = vmov (!%p211_p10), 0.0   ;;  %vm274_vm1 = vcmask (!%p211_p10), 261120   ;;  %s943_s21 = sand.u32 (!%p211_p10), 1, %s817_s16  }
  0x11   : > { %214 = sbr.rel (%p211_p10) target bundleno = 791 (0x317), region = 32  ;;  %650 = vmatprep.subr.bf16.mxu0 (!%p211_p10), %v835_v0  ;;  %642 = vmatprep.mubr.msk.f32.mxu0 (!%p211_p10), %vm836_vm0, %v837_v1  ;;  %v349_v10 = vlaneseq (!%p211_p10)  ;;  %vm357_vm3 = vcmask (!%p211_p10), 64512   ;;  %s612_s22 = sshll.u32 (!%p211_p10), %s943_s21, 3 }
  0x12   : > { %645 = vmatprep.subr.mxu1 (!%p211_p10), %v837_v1  ;;  %647 = vmatprep.mubr.msk.f32.mxu1 (!%p211_p10), %vm836_vm0, %v837_v1  ;;  %s251_s24 = scalar_lea.vmem (!%p211_p10), [#allocation4], %s612_s22  ;;  %s622_s26 = sshll.u32 (!%p211_p10), %s825_s18, 7 }
  0x13   : > { %v350_v11 = vshrl.u32 (!%p211_p10), %v349_v10, 7  ;;  %v354_v12 = vand.u32 (!%p211_p10), 127, %v349_v10  ;;  %s479_s6 = sshll.u32 (!%p211_p10), %s251_s24, 4  ;;  %s451_s7 = scalar_lea.sflag (!%p211_p10), [#allocation5], %s943_s21  ;;  %s480_s6 = int_to_ptr.vmem [resolvable:$true] %s479_s6 }
  0x14   : > { %s838_s9 = smov (!%p211_p10), [#allocation4]  }
  0x15   : > { %vm355_vm2 = vcmp.eq.s32.totalorder (!%p211_p10), %v350_v11, %v354_v12  ;;  %s727_s10 = sshll.u32 (!%p211_p10), %s838_s9, 4  ;;  %s728_s10 = int_to_ptr.vmem [resolvable:$false] %s727_s10 }
  0x16   : > { %p730_p1 = scmp.lt.s32.totalorder (!%p211_p10), %s480_s6, %s728_s10 }
  0x18   : > { %s922_s29 = scalar_select %p252_p11, %s825_s18, 1 }
  0x1a   : > { %s626_s30 = sshll.u32 %s922_s29, 5  ;;  %s614_s5 = sshll.u32 %s922_s29, 3 }
  0x1b   : > { %s263_s8 = scalar_lea.vmem %s1033_s1, %s626_s30  ;;  %s258_s11 = scalar_lea.vmem %s1032_s0, %s614_s5 }
  0x1c   : > { %v270_v2 = vld [vmem:[%s263_s8] sm:$0xff]  ;;  %v271_v3 = vld [vmem:[%s263_s8 + $0x8] sm:$0xff]  ;;  %v272_v4 = vld [vmem:[%s263_s8 + $0x10] sm:$0xff]  ;;  %s267_s14 = scalar_lea.vmem %s1034_s2, %s614_s5  ;;  %s956_s5 = scalar_lea.hbm %s1036_s4, %s622_s26 }
  0x1d   : > { %v651_v5 = vpack.c.bf16 %v271_v3, %v270_v2  ;;  %v273_v6 = vld [vmem:[%s263_s8 + $0x18] sm:$0xff]  ;;  %v268_v8 = vld [vmem:[%s258_s11] sm:$0xff]  ;;  %s723_s8 = scalar_lea.vmem %s480_s6, 128  ;;  %s729_s11 = scalar_lea.vmem %s728_s10, 256 }
  0x1e   : > { %v654_v7 = vpack.c.bf16 %v273_v6, %v272_v4  ;;  %v269_v9 = vmul.f32 0.17677669, %v268_v8  ;;  %v370_v22 = vld [vmem:[%s267_s14] sm:$0xff]  ;;  %p724_p12 = scmp.ne.s32.totalorder %s480_s6, %s723_s8  ;;  %p731_p2 = scmp.lt.s32.totalorder %s729_s11, %s723_s8 }
  0x1f   : > { %652 = vmatpush3.bf16.msra.mxu0 %v651_v5  ;;  %646 = vmatpush3.msra.mxu1 %v370_v22 }
  0x20   : > { %653 = vmatprep.subr.bf16.mxu0 %v835_v0  ;;  %p725_p13 = pnand %p724_p12, %p905_p4  ;;  %p732_p3 = por %p731_p2, %p730_p1 }
  0x22   : > { %p726_p0 = pneg %p725_p13 }
  0x23   : > { %655 = vmatpush3.bf16.msra.mxu0 %v654_v7 }
  0x24   : > { %p733_p5 = pnand %p732_p3, %p726_p0 }
  0x26   : > { %643 = vmatmul.mubr.msk.f32.vlgmr.msra.gmra.mrb[0].mxu0 %vm274_vm1, %v269_v9 }
  0xf9   : > { %v344_v13 = vpop.f32.mrb[0].mxu0 }
  0xfa   : > { %v356_v14 = vsel %vm355_vm2, -50000.0, %v344_v13  ;;  %v644_v15 = vpop.f32.mrb[1].mxu0 }
  0xfb   : > { %v358_v16 = vsel %vm357_vm3, %v356_v14, -inf }
  0xfc   : > { %359 = vmax.xlane.f32.xlu0 %v358_v16 }
 0x189   : > { %v360_v17 = vpop.xlane.xlu0 %359 }
 0x18a   : > { %v361_v18 = vsub.f32 %v356_v14, %v360_v17 }
 0x18c   : > { %v362_v19 = vmul.f32 1.442695, %v361_v18 }
 0x18e   : > { %719 = vpow2.f32 %v362_v19 }
 0x198   : > { %v720_v20 = vpop.eup %719 }
 0x199   : > { %v364_v21 = vsel %vm357_vm3, %v720_v20, 0.0 }
 0x19a   : > { %365 = vadd.xlane.f32.xlu0 %v364_v21 }
 0x227   : > { %v366_v23 = vpop.xlane.xlu0 %365 }
 0x228   : > { %721 = vrcp.f32 %v366_v23 }
 0x232   : > { %v722_v24 = vpop.eup %721 }
 0x233   : > { %v368_v25 = vmul.f32 %v722_v24, %v720_v20 }
 0x235   : > { %648 = vmatmul.mubr.msk.f32.vlgmr.msra.gmra.mrb[0].mxu1 %vm357_vm3, %v368_v25  ;;  %369 = vst.msk [vmem:[%s251_s24] sm:$0xff] %vm357_vm3, %v368_v25 }
 0x236   : > { %736 = shalt.err (!%p733_p5)
}
 0x237   : > { %s737_s12 = scalar_lea.hbm %s956_s5, 128  ;;  %s741_s24 = scalar_lea.hbm %s1036_s4, 256 }
 0x238   : > { %p738_p6 = scmp.ne.s32.totalorder %s956_s5, %s737_s12  ;;  %p742_p10 = scmp.lt.u32.totalorder %s956_s5, %s1036_s4 }
 0x239   : > { %p743_p11 = scmp.lt.u32.totalorder %s741_s24, %s737_s12  ;;  %p745_p13 = scmp.lt.u32.totalorder %s737_s12, %s956_s5 }
 0x23a   : > { %p739_p7 = pnand %p738_p6, %p905_p4 }
 0x23b   : > { %p744_p12 = por %p743_p11, %p742_p10 }
 0x23c   : > { %p740_p9 = pneg %p739_p7 }
 0x23d   : > { %p746_p0 = por %p745_p13, %p744_p12 }
 0x23f   : > { %p747_p1 = pnand %p746_p0, %p740_p9 }
 0x241   : > { %750 = shalt.err (!%p747_p1)
}
 0x242   : > { %657 = dma.vmem_to_hbm [thread:$0]  (%p905_p4), %s480_s6, 128, %s956_s5, %s451_s7  }
 0x243   : > { %s244_s8 = scalar_lea.vmem [#allocation2], %s612_s22  ;;  %s983_s13 = scalar_lea.hbm %s1035_s3, %s622_s26 }
 0x244   : > { %s465_s9 = sshll.u32 %s244_s8, 4  ;;  %s446_s12 = scalar_lea.sflag [#allocation3], %s943_s21  ;;  %s985_s9 = int_to_ptr.vmem [resolvable:$true] %s465_s9 }
 0x245   : > { %s751_s5 = scalar_lea.vmem %s985_s9, 128  ;;  %s839_s18 = smov [#allocation2]  }
 0x246   : > { %p752_p2 = scmp.ne.s32.totalorder %s985_s9, %s751_s5  ;;  %s755_s22 = sshll.u32 %s839_s18, 4  ;;  %s756_s22 = int_to_ptr.vmem [resolvable:$false] %s755_s22 }
 0x247   : > { %s757_s26 = scalar_lea.vmem %s756_s22, 256  ;;  %p758_p6 = scmp.lt.s32.totalorder %s985_s9, %s756_s22 }
 0x248   : > { %p753_p3 = pnand %p752_p2, %p905_p4  ;;  %p759_p7 = scmp.lt.s32.totalorder %s757_s26, %s751_s5 }
 0x24a   : > { %p754_p5 = pneg %p753_p3  ;;  %p760_p9 = por %p759_p7, %p758_p6 }
 0x24c   : > { %p761_p10 = pnand %p760_p9, %p754_p5 }
 0x308   : > { %v440_v26 = vpop.f32.mrb[0].mxu1 }
 0x309   : > { %444 = vst.msk [vmem:[%s244_s8] sm:$0xff] %vm274_vm1, %v440_v26  ;;  %v649_v27 = vpop.f32.mrb[1].mxu1 }
 0x30a   : > { %764 = shalt.err (!%p761_p10)
}
 0x30b   : > { %s765_s21 = scalar_lea.hbm %s983_s13, 128  ;;  %s769_s14 = scalar_lea.hbm %s1035_s3, 256 }
 0x30c   : > { %p766_p11 = scmp.ne.s32.totalorder %s983_s13, %s765_s21  ;;  %p770_p0 = scmp.lt.u32.totalorder %s983_s13, %s1035_s3 }
 0x30d   : > { %p771_p1 = scmp.lt.u32.totalorder %s769_s14, %s765_s21  ;;  %p773_p3 = scmp.lt.u32.totalorder %s765_s21, %s983_s13 }
 0x30e   : > { %p767_p12 = pnand %p766_p11, %p905_p4 }
 0x30f   : > { %p772_p2 = por %p771_p1, %p770_p0 }
 0x310   : > { %p768_p13 = pneg %p767_p12 }
 0x311   : > { %p774_p5 = por %p773_p3, %p772_p2 }
 0x313   : > { %p775_p6 = pnand %p774_p5, %p768_p13 }
 0x315   : > { %778 = shalt.err (!%p775_p6)
}
 0x316   : > { %656 = dma.vmem_to_hbm [thread:$0]  (%p905_p4), %s985_s9, 128, %s983_s13, %s446_s12  }
 0x317 PF: > { %p667_p7 = scmp.ge.s32.totalorder %s833_s20, 2  ;;  %s491_s30 = sand.u32 1, %s813_s15  }
 0x318   : > { %s492_s8 = scalar_lea.sflag [#allocation3], %s491_s30 }
 0x319   : > { %p661_p9 = pnand %p667_p7, %p912_p8 }
 0x31b   : > { %804 = dma.done.wait (!%p661_p9), %s492_s8, 128  }
 0x31c   : > { %806 = vsyncadd (!%p661_p9), %s492_s8, 4294967168  ;;  %s501_s10 = scalar_lea.sflag [#allocation5], %s491_s30 }
 0x31d   : > { %808 = dma.done.wait (!%p661_p9), %s501_s10, 128  }
 0x31e   : > { %810 = vsyncadd (!%p661_p9), %s501_s10, 4294967168  ;;  %s21_s20 = sadd.s32 1, %s833_s20   ;;  %s1039_s15 = smov %s817_s16 }
 0x31f   : > { %p18_p10 = scmp.ge.s32.totalorder %s21_s20, 4   ;;  %s1040_s16 = smov %s821_s17 }
 0x320   : > { %s1041_s17 = smov %s918_s28  ;;  %s1042_s18 = smov %s829_s19 }
 0x321   : > { %s1043_s19 = smov %s1045_s23  ;;  %20 = sbr.rel (!%p18_p10) target bundleno = 6 (0x6), region = 90 }
 0x328   :  { %506 = vsyncpa [#allocation3], 1 }
 0x329   :  { %508 = vsyncpa [#allocation3 + $0x1], 1 }
 0x32a   :  { %509 = vsyncpa [#allocation5], 1 }
 0x32b   :  { %511 = vsyncpa [#allocation5 + $0x1], 1 }

</bundles_post_ra>
